<compile_context>
chip_gen: v6e
topology: v6e:2x2x1
jax: 0.10.0
libtpu: 0.0.40
codegen_flags: <defaults>
</compile_context>

<pallas_src>
import functools

import jax
import jax.numpy as jnp
from jax.experimental import pallas as pl
from jax.experimental.pallas import tpu as pltpu


# --------------------------------------------------------------------------
# Kernels
# --------------------------------------------------------------------------

def _proj_kernel(x_ref, w_ref, b_ref, o_ref):
    """o = x @ w + b  (w already transposed to (in, out); b already fused)."""
    o_ref[...] = (
        jnp.dot(x_ref[...].astype(w_ref.dtype), w_ref[...],
                preferred_element_type=jnp.float32)
        + b_ref[...]
    ).astype(o_ref.dtype)


def _recurrence_kernel(proj_ref, w_hh_t_ref, out_ref, h_ref, *, t_blk):
    """One RNN layer over a chunk of t_blk timesteps (time-major layout).

    proj_ref : (t_blk, B, H)  pre-computed input projection (+ fused bias)
    w_hh_t   : (H, H)         pre-transposed recurrent weight
    out_ref  : (t_blk, B, H)  per-timestep hidden outputs (next layer's input)
    h_ref    : (B, H) VMEM scratch; persists across time-chunk grid steps
    """
    c = pl.program_id(0)

    @pl.when(c == 0)
    def _():
        # h0 = zeros, matching torch.zeros(layer_dim, B, hidden_dim)
        h_ref[...] = jnp.zeros_like(h_ref)

    w_hh_t = w_hh_t_ref[...]
    # Static unroll over the chunk; only this matmul is on the serial chain.
    for i in range(t_blk):
        h_new = jnp.maximum(
            proj_ref[i]
            + jnp.dot(h_ref[...].astype(w_hh_t.dtype), w_hh_t,
                      preferred_element_type=jnp.float32),
            0.0)                                   # nonlinearity='relu'
        h_ref[...] = h_new
        out_ref[i] = h_new.astype(out_ref.dtype)


def _fc_logsoftmax_kernel(h_ref, w_fc_t_ref, b_fc_ref, o_ref):
    """logits = h @ w_fc_t + b_fc ; out = log_softmax(logits, axis=1)."""
    logits = (jnp.dot(h_ref[...].astype(w_fc_t_ref.dtype), w_fc_t_ref[...],
                      preferred_element_type=jnp.float32)
              + b_fc_ref[...])
    m = jnp.max(logits, axis=1, keepdims=True)
    z = logits - m
    lse = jnp.log(jnp.sum(jnp.exp(z), axis=1, keepdims=True))
    o_ref[...] = (z - lse).astype(o_ref.dtype)


# --------------------------------------------------------------------------
# Wrapper
# --------------------------------------------------------------------------

def _pick_time_block(T, requested=32):
    """Largest t_blk <= requested that divides T.  t_blk is the 3rd-minor dim
    of the recurrence block, so it has no (8,128) tiling constraint."""
    for cand in range(min(requested, T), 0, -1):
        if T % cand == 0:
            return cand
    return 1


def _project(x2d, w_t, b, hidden_dim):
    """proj2d = x2d @ w_t + b over all T*B rows (one batched matmul)."""
    R, in_l = x2d.shape
    rb = R if R <= 512 else 512          # row tile (512 is a multiple of 8)
    return pl.pallas_call(
        _proj_kernel,
        out_shape=jax.ShapeDtypeStruct((R, hidden_dim), jnp.float32),
        grid_spec=pltpu.PrefetchScalarGridSpec(
            num_scalar_prefetch=0,
            grid=(pl.cdiv(R, rb),),
            in_specs=[
                pl.BlockSpec((rb, in_l), lambda r: (r, 0)),
                pl.BlockSpec((in_l, hidden_dim), lambda r: (0, 0)),
                pl.BlockSpec((1, hidden_dim), lambda r: (0, 0)),
            ],
            out_specs=pl.BlockSpec((rb, hidden_dim), lambda r: (r, 0)),
        ),
        compiler_params=pltpu.CompilerParams(
            dimension_semantics=("parallel",)),
    )(x2d, w_t, b)


def rnn_model_forward(x, params, *, hidden_dim, layer_dim, output_dim,
                      t_blk=32, compute_dtype=jnp.float32):
    """params: dict with 'rnn' = list of (w_ih, w_hh, b_ih, b_hh) per layer
    (PyTorch (out, in) convention), 'w_fc' (O, H), 'b_fc' (1, O)."""
    B, T, _ = x.shape
    t_blk = _pick_time_block(T, t_blk)

    # Time-major activations: per-timestep slabs are contiguous (B, H) tiles.
    seq_tm = jnp.transpose(x, (1, 0, 2))          # (T, B, in_0)

    for l in range(layer_dim):
        w_ih, w_hh, b_ih, b_hh = params["rnn"][l]
        in_l = w_ih.shape[1]
        # Wrapper-side layout plumbing: pre-transpose weights, pre-fuse biases.
        w_ih_t = w_ih.T.astype(compute_dtype)           # (in_l, H)
        w_hh_t = w_hh.T.astype(compute_dtype)           # (H, H)
        b = (b_ih + b_hh).reshape(1, hidden_dim).astype(jnp.float32)

        # --- hoisted input projection: one matmul over T*B rows -------------
        proj = _project(seq_tm.reshape(T * B, in_l), w_ih_t, b, hidden_dim)
        proj_tm = proj.reshape(T, B, hidden_dim)

        # --- time-chunked recurrence, hidden state resident in VMEM ---------
        seq_tm = pl.pallas_call(
            functools.partial(_recurrence_kernel, t_blk=t_blk),
            out_shape=jax.ShapeDtypeStruct((T, B, hidden_dim), jnp.float32),
            grid_spec=pltpu.PrefetchScalarGridSpec(
                num_scalar_prefetch=0,
                grid=(T // t_blk,),
                in_specs=[
                    pl.BlockSpec((t_blk, B, hidden_dim),
                                 lambda c: (c, 0, 0)),
                    pl.BlockSpec((hidden_dim, hidden_dim),
                                 lambda c: (0, 0)),
                ],
                out_specs=pl.BlockSpec((t_blk, B, hidden_dim),
                                       lambda c: (c, 0, 0)),
                scratch_shapes=[pltpu.VMEM((B, hidden_dim), jnp.float32)],
            ),
            compiler_params=pltpu.CompilerParams(
                dimension_semantics=("arbitrary",)),  # sequential recurrence
        )(proj_tm, w_hh_t)

    # --- fc + log-softmax on the last timestep of the top layer -------------
    last_h = seq_tm[T - 1]                                 # (B, H)
    w_fc_t = params["w_fc"].T.astype(compute_dtype)        # (H, O)
    b_fc = params["b_fc"].reshape(1, output_dim).astype(jnp.float32)

    out = pl.pallas_call(
        _fc_logsoftmax_kernel,
        out_shape=jax.ShapeDtypeStruct((B, output_dim), jnp.float32),
    )(last_h, w_fc_t, b_fc)
    return out


# --------------------------------------------------------------------------
# Params / reference
# --------------------------------------------------------------------------

def init_params(key, input_dim, hidden_dim, layer_dim, output_dim):
    """Deterministic init mirroring PyTorch's uniform(-1/sqrt(H), 1/sqrt(H))."""
    k = 1.0 / jnp.sqrt(jnp.float32(hidden_dim))
    rnn = []
    for l in range(layer_dim):
        in_l = input_dim if l == 0 else hidden_dim
        key, k1, k2, k3, k4 = jax.random.split(key, 5)
        rnn.append((
            jax.random.uniform(k1, (hidden_dim, in_l), jnp.float32, -k, k),
            jax.random.uniform(k2, (hidden_dim, hidden_dim), jnp.float32, -k, k),
            jax.random.uniform(k3, (1, hidden_dim), jnp.float32, -k, k),
            jax.random.uniform(k4, (1, hidden_dim), jnp.float32, -k, k),
        ))
    key, k1, k2 = jax.random.split(key, 3)
    w_fc = jax.random.uniform(k1, (output_dim, hidden_dim), jnp.float32, -k, k)
    b_fc = jax.random.uniform(k2, (1, output_dim), jnp.float32, -k, k)
    return {"rnn": rnn, "w_fc": w_fc, "b_fc": b_fc}


def reference_forward(x, params, *, hidden_dim, layer_dim):
    """Pure-JAX reference matching torch semantics (f32 matmuls)."""
    hp = jax.lax.Precision.HIGHEST
    B, T, _ = x.shape
    h = [jnp.zeros((B, hidden_dim), jnp.float32) for _ in range(layer_dim)]
    for t in range(T):
        inp = x[:, t, :]
        for l in range(layer_dim):
            w_ih, w_hh, b_ih, b_hh = params["rnn"][l]
            inp = jnp.maximum(
                jnp.dot(inp, w_ih.T, precision=hp)
                + jnp.dot(h[l], w_hh.T, precision=hp)
                + b_ih + b_hh, 0.0)
            h[l] = inp
    logits = jnp.dot(h[-1], params["w_fc"].T, precision=hp) + params["b_fc"]
    return jax.nn.log_softmax(logits, axis=1)


if __name__ == "__main__":
    B, T = 2, 8
    input_dim, hidden_dim, layer_dim, output_dim = 16, 32, 2, 10

    key = jax.random.PRNGKey(0)
    key, kx = jax.random.split(key)
    x = jax.random.normal(kx, (B, T, input_dim), jnp.float32)
    params = init_params(key, input_dim, hidden_dim, layer_dim, output_dim)

    fwd = jax.jit(functools.partial(
        rnn_model_forward, hidden_dim=hidden_dim, layer_dim=layer_dim,
        output_dim=output_dim))
    out = jax.block_until_ready(fwd(x, params))

    ref = reference_forward(x, params, hidden_dim=hidden_dim,
                            layer_dim=layer_dim)
    assert out.shape == (B, output_dim)
    assert jnp.allclose(out, ref, atol=5e-4, rtol=5e-4), "mismatch vs reference"

    print("KERNEL_OK")
</pallas_src>

<mosaic_0001>
module attributes {stable_mosaic.version = 11 : i64} {
  func.func @_recurrence_kernel(%arg0: i32, %arg1: memref<8x2x32xf32, #tpu.memory_space<vmem>>, %arg2: memref<32x32xf32, #tpu.memory_space<vmem>>, %arg3: memref<8x2x32xf32, #tpu.memory_space<vmem>>, %arg4: memref<2x32xf32, #tpu.memory_space<vmem>>) attributes {dimension_semantics = [#tpu.dimension_semantics<arbitrary>], iteration_bounds = array<i64: 1>, scalar_prefetch = 0 : i64, scratch_operands = 1 : i64, tpu.core_type = #tpu.core_type<tc>, window_params = [{transform_indices = @transform_0, window_bounds = array<i64: 8, 2, 32>}, {pipeline_mode = #tpu.pipeline_mode<synchronous>, transform_indices = @transform_1, window_bounds = array<i64: 32, 32>}, {transform_indices = @transform_2, window_bounds = array<i64: 8, 2, 32>}]} {
    %c0_i32 = arith.constant 0 : i32
    %0 = arith.cmpi eq, %arg0, %c0_i32 : i32
    %1 = arith.extui %0 : i1 to i32
    %c0_i32_0 = arith.constant 0 : i32
    %2 = arith.cmpi ne, %1, %c0_i32_0 : i32
    scf.if %2 {
      %cst_90 = arith.constant 0.000000e+00 : f32
      %92 = vector.broadcast %cst_90 : f32 to vector<2x32xf32>
      %c0_91 = arith.constant 0 : index
      %c0_92 = arith.constant 0 : index
      %93 = vector.load %arg4[%c0_91, %c0_92] : memref<2x32xf32, #tpu.memory_space<vmem>>, vector<2x32xf32>
      tpu.vector_store %arg4[%c0_91, %c0_92], %92 {strides = array<i32>} : memref<2x32xf32, #tpu.memory_space<vmem>>, vector<2x32xf32>,
    } else {
    }
    %c0 = arith.constant 0 : index
    %c0_1 = arith.constant 0 : index
    %3 = vector.load %arg2[%c0, %c0_1] : memref<32x32xf32, #tpu.memory_space<vmem>>, vector<32x32xf32>
    %c0_2 = arith.constant 0 : index
    %c0_3 = arith.constant 0 : index
    %c0_4 = arith.constant 0 : index
    %4 = vector.load %arg1[%c0_2, %c0_3, %c0_4] : memref<8x2x32xf32, #tpu.memory_space<vmem>>, vector<1x2x32xf32>
    %5 = vector.shape_cast %4 : vector<1x2x32xf32> to vector<2x32xf32>
    %c0_5 = arith.constant 0 : index
    %c0_6 = arith.constant 0 : index
    %6 = vector.load %arg4[%c0_5, %c0_6] : memref<2x32xf32, #tpu.memory_space<vmem>>, vector<2x32xf32>
    %cst = arith.constant dense<0.000000e+00> : vector<2x32xf32>
    %7 = tpu.matmul %6, %3, %cst {dimension_numbers = #tpu.dot_dimension_numbers<[1], [0], [0], [1], [0, 0, 1, 1], [], []>} : vector<2x32xf32>, vector<32x32xf32>, vector<2x32xf32> -> vector<2x32xf32>
    %8 = arith.addf %5, %7 : vector<2x32xf32>
    %cst_7 = arith.constant 0.000000e+00 : f32
    %9 = vector.broadcast %cst_7 : f32 to vector<2x32xf32>
    %10 = arith.maximumf %8, %9 : vector<2x32xf32>
    %c0_8 = arith.constant 0 : index
    %c0_9 = arith.constant 0 : index
    %11 = vector.load %arg4[%c0_8, %c0_9] : memref<2x32xf32, #tpu.memory_space<vmem>>, vector<2x32xf32>
    tpu.vector_store %arg4[%c0_8, %c0_9], %10 {strides = array<i32>} : memref<2x32xf32, #tpu.memory_space<vmem>>, vector<2x32xf32>,
    %c0_10 = arith.constant 0 : index
    %c0_11 = arith.constant 0 : index
    %c0_12 = arith.constant 0 : index
    %12 = vector.load %arg3[%c0_10, %c0_11, %c0_12] : memref<8x2x32xf32, #tpu.memory_space<vmem>>, vector<1x2x32xf32>
    %13 = vector.shape_cast %12 : vector<1x2x32xf32> to vector<2x32xf32>
    %14 = vector.shape_cast %10 : vector<2x32xf32> to vector<1x2x32xf32>
    tpu.vector_store %arg3[%c0_10, %c0_11, %c0_12], %14 {strides = array<i32>} : memref<8x2x32xf32, #tpu.memory_space<vmem>>, vector<1x2x32xf32>,
    %c1 = arith.constant 1 : index
    %c0_13 = arith.constant 0 : index
    %c0_14 = arith.constant 0 : index
    %15 = vector.load %arg1[%c1, %c0_13, %c0_14] : memref<8x2x32xf32, #tpu.memory_space<vmem>>, vector<1x2x32xf32>
    %16 = vector.shape_cast %15 : vector<1x2x32xf32> to vector<2x32xf32>
    %c0_15 = arith.constant 0 : index
    %c0_16 = arith.constant 0 : index
    %17 = vector.load %arg4[%c0_15, %c0_16] : memref<2x32xf32, #tpu.memory_space<vmem>>, vector<2x32xf32>
    %cst_17 = arith.constant dense<0.000000e+00> : vector<2x32xf32>
    %18 = tpu.matmul %17, %3, %cst_17 {dimension_numbers = #tpu.dot_dimension_numbers<[1], [0], [0], [1], [0, 0, 1, 1], [], []>} : vector<2x32xf32>, vector<32x32xf32>, vector<2x32xf32> -> vector<2x32xf32>
    %19 = arith.addf %16, %18 : vector<2x32xf32>
    %cst_18 = arith.constant 0.000000e+00 : f32
    %20 = vector.broadcast %cst_18 : f32 to vector<2x32xf32>
    %21 = arith.maximumf %19, %20 : vector<2x32xf32>
    %c0_19 = arith.constant 0 : index
    %c0_20 = arith.constant 0 : index
    %22 = vector.load %arg4[%c0_19, %c0_20] : memref<2x32xf32, #tpu.memory_space<vmem>>, vector<2x32xf32>
    tpu.vector_store %arg4[%c0_19, %c0_20], %21 {strides = array<i32>} : memref<2x32xf32, #tpu.memory_space<vmem>>, vector<2x32xf32>,
    %c1_21 = arith.constant 1 : index
    %c0_22 = arith.constant 0 : index
    %c0_23 = arith.constant 0 : index
    %23 = vector.load %arg3[%c1_21, %c0_22, %c0_23] : memref<8x2x32xf32, #tpu.memory_space<vmem>>, vector<1x2x32xf32>
    %24 = vector.shape_cast %23 : vector<1x2x32xf32> to vector<2x32xf32>
    %25 = vector.shape_cast %21 : vector<2x32xf32> to vector<1x2x32xf32>
    tpu.vector_store %arg3[%c1_21, %c0_22, %c0_23], %25 {strides = array<i32>} : memref<8x2x32xf32, #tpu.memory_space<vmem>>, vector<1x2x32xf32>,
    %c2 = arith.constant 2 : index
    %c0_24 = arith.constant 0 : index
    %c0_25 = arith.constant 0 : index
    %26 = vector.load %arg1[%c2, %c0_24, %c0_25] : memref<8x2x32xf32, #tpu.memory_space<vmem>>, vector<1x2x32xf32>
    %27 = vector.shape_cast %26 : vector<1x2x32xf32> to vector<2x32xf32>
    %c0_26 = arith.constant 0 : index
    %c0_27 = arith.constant 0 : index
    %28 = vector.load %arg4[%c0_26, %c0_27] : memref<2x32xf32, #tpu.memory_space<vmem>>, vector<2x32xf32>
    %cst_28 = arith.constant dense<0.000000e+00> : vector<2x32xf32>
    %29 = tpu.matmul %28, %3, %cst_28 {dimension_numbers = #tpu.dot_dimension_numbers<[1], [0], [0], [1], [0, 0, 1, 1], [], []>} : vector<2x32xf32>, vector<32x32xf32>, vector<2x32xf32> -> vector<2x32xf32>
    %30 = arith.addf %27, %29 : vector<2x32xf32>
    %cst_29 = arith.constant 0.000000e+00 : f32
    %31 = vector.broadcast %cst_29 : f32 to vector<2x32xf32>
    %32 = arith.maximumf %30, %31 : vector<2x32xf32>
    %c0_30 = arith.constant 0 : index
    %c0_31 = arith.constant 0 : index
    %33 = vector.load %arg4[%c0_30, %c0_31] : memref<2x32xf32, #tpu.memory_space<vmem>>, vector<2x32xf32>
    tpu.vector_store %arg4[%c0_30, %c0_31], %32 {strides = array<i32>} : memref<2x32xf32, #tpu.memory_space<vmem>>, vector<2x32xf32>,
    %c2_32 = arith.constant 2 : index
    %c0_33 = arith.constant 0 : index
    %c0_34 = arith.constant 0 : index
    %34 = vector.load %arg3[%c2_32, %c0_33, %c0_34] : memref<8x2x32xf32, #tpu.memory_space<vmem>>, vector<1x2x32xf32>
    %35 = vector.shape_cast %34 : vector<1x2x32xf32> to vector<2x32xf32>
    %36 = vector.shape_cast %32 : vector<2x32xf32> to vector<1x2x32xf32>
    tpu.vector_store %arg3[%c2_32, %c0_33, %c0_34], %36 {strides = array<i32>} : memref<8x2x32xf32, #tpu.memory_space<vmem>>, vector<1x2x32xf32>,
    %c3 = arith.constant 3 : index
    %c0_35 = arith.constant 0 : index
    %c0_36 = arith.constant 0 : index
    %37 = vector.load %arg1[%c3, %c0_35, %c0_36] : memref<8x2x32xf32, #tpu.memory_space<vmem>>, vector<1x2x32xf32>
    %38 = vector.shape_cast %37 : vector<1x2x32xf32> to vector<2x32xf32>
    %c0_37 = arith.constant 0 : index
    %c0_38 = arith.constant 0 : index
    %39 = vector.load %arg4[%c0_37, %c0_38] : memref<2x32xf32, #tpu.memory_space<vmem>>, vector<2x32xf32>
    %cst_39 = arith.constant dense<0.000000e+00> : vector<2x32xf32>
    %40 = tpu.matmul %39, %3, %cst_39 {dimension_numbers = #tpu.dot_dimension_numbers<[1], [0], [0], [1], [0, 0, 1, 1], [], []>} : vector<2x32xf32>, vector<32x32xf32>, vector<2x32xf32> -> vector<2x32xf32>
    %41 = arith.addf %38, %40 : vector<2x32xf32>
    %cst_40 = arith.constant 0.000000e+00 : f32
    %42 = vector.broadcast %cst_40 : f32 to vector<2x32xf32>
    %43 = arith.maximumf %41, %42 : vector<2x32xf32>
    %c0_41 = arith.constant 0 : index
    %c0_42 = arith.constant 0 : index
    %44 = vector.load %arg4[%c0_41, %c0_42] : memref<2x32xf32, #tpu.memory_space<vmem>>, vector<2x32xf32>
    tpu.vector_store %arg4[%c0_41, %c0_42], %43 {strides = array<i32>} : memref<2x32xf32, #tpu.memory_space<vmem>>, vector<2x32xf32>,
    %c3_43 = arith.constant 3 : index
    %c0_44 = arith.constant 0 : index
    %c0_45 = arith.constant 0 : index
    %45 = vector.load %arg3[%c3_43, %c0_44, %c0_45] : memref<8x2x32xf32, #tpu.memory_space<vmem>>, vector<1x2x32xf32>
    %46 = vector.shape_cast %45 : vector<1x2x32xf32> to vector<2x32xf32>
    %47 = vector.shape_cast %43 : vector<2x32xf32> to vector<1x2x32xf32>
    tpu.vector_store %arg3[%c3_43, %c0_44, %c0_45], %47 {strides = array<i32>} : memref<8x2x32xf32, #tpu.memory_space<vmem>>, vector<1x2x32xf32>,
    %c4 = arith.constant 4 : index
    %c0_46 = arith.constant 0 : index
    %c0_47 = arith.constant 0 : index
    %48 = vector.load %arg1[%c4, %c0_46, %c0_47] : memref<8x2x32xf32, #tpu.memory_space<vmem>>, vector<1x2x32xf32>
    %49 = vector.shape_cast %48 : vector<1x2x32xf32> to vector<2x32xf32>
    %c0_48 = arith.constant 0 : index
    %c0_49 = arith.constant 0 : index
    %50 = vector.load %arg4[%c0_48, %c0_49] : memref<2x32xf32, #tpu.memory_space<vmem>>, vector<2x32xf32>
    %cst_50 = arith.constant dense<0.000000e+00> : vector<2x32xf32>
    %51 = tpu.matmul %50, %3, %cst_50 {dimension_numbers = #tpu.dot_dimension_numbers<[1], [0], [0], [1], [0, 0, 1, 1], [], []>} : vector<2x32xf32>, vector<32x32xf32>, vector<2x32xf32> -> vector<2x32xf32>
    %52 = arith.addf %49, %51 : vector<2x32xf32>
    %cst_51 = arith.constant 0.000000e+00 : f32
    %53 = vector.broadcast %cst_51 : f32 to vector<2x32xf32>
    %54 = arith.maximumf %52, %53 : vector<2x32xf32>
    %c0_52 = arith.constant 0 : index
    %c0_53 = arith.constant 0 : index
    %55 = vector.load %arg4[%c0_52, %c0_53] : memref<2x32xf32, #tpu.memory_space<vmem>>, vector<2x32xf32>
    tpu.vector_store %arg4[%c0_52, %c0_53], %54 {strides = array<i32>} : memref<2x32xf32, #tpu.memory_space<vmem>>, vector<2x32xf32>,
    %c4_54 = arith.constant 4 : index
    %c0_55 = arith.constant 0 : index
    %c0_56 = arith.constant 0 : index
    %56 = vector.load %arg3[%c4_54, %c0_55, %c0_56] : memref<8x2x32xf32, #tpu.memory_space<vmem>>, vector<1x2x32xf32>
    %57 = vector.shape_cast %56 : vector<1x2x32xf32> to vector<2x32xf32>
    %58 = vector.shape_cast %54 : vector<2x32xf32> to vector<1x2x32xf32>
    tpu.vector_store %arg3[%c4_54, %c0_55, %c0_56], %58 {strides = array<i32>} : memref<8x2x32xf32, #tpu.memory_space<vmem>>, vector<1x2x32xf32>,
    %c5 = arith.constant 5 : index
    %c0_57 = arith.constant 0 : index
    %c0_58 = arith.constant 0 : index
    %59 = vector.load %arg1[%c5, %c0_57, %c0_58] : memref<8x2x32xf32, #tpu.memory_space<vmem>>, vector<1x2x32xf32>
    %60 = vector.shape_cast %59 : vector<1x2x32xf32> to vector<2x32xf32>
    %c0_59 = arith.constant 0 : index
    %c0_60 = arith.constant 0 : index
    %61 = vector.load %arg4[%c0_59, %c0_60] : memref<2x32xf32, #tpu.memory_space<vmem>>, vector<2x32xf32>
    %cst_61 = arith.constant dense<0.000000e+00> : vector<2x32xf32>
    %62 = tpu.matmul %61, %3, %cst_61 {dimension_numbers = #tpu.dot_dimension_numbers<[1], [0], [0], [1], [0, 0, 1, 1], [], []>} : vector<2x32xf32>, vector<32x32xf32>, vector<2x32xf32> -> vector<2x32xf32>
    %63 = arith.addf %60, %62 : vector<2x32xf32>
    %cst_62 = arith.constant 0.000000e+00 : f32
    %64 = vector.broadcast %cst_62 : f32 to vector<2x32xf32>
    %65 = arith.maximumf %63, %64 : vector<2x32xf32>
    %c0_63 = arith.constant 0 : index
    %c0_64 = arith.constant 0 : index
    %66 = vector.load %arg4[%c0_63, %c0_64] : memref<2x32xf32, #tpu.memory_space<vmem>>, vector<2x32xf32>
    tpu.vector_store %arg4[%c0_63, %c0_64], %65 {strides = array<i32>} : memref<2x32xf32, #tpu.memory_space<vmem>>, vector<2x32xf32>,
    %c5_65 = arith.constant 5 : index
    %c0_66 = arith.constant 0 : index
    %c0_67 = arith.constant 0 : index
    %67 = vector.load %arg3[%c5_65, %c0_66, %c0_67] : memref<8x2x32xf32, #tpu.memory_space<vmem>>, vector<1x2x32xf32>
    %68 = vector.shape_cast %67 : vector<1x2x32xf32> to vector<2x32xf32>
    %69 = vector.shape_cast %65 : vector<2x32xf32> to vector<1x2x32xf32>
    tpu.vector_store %arg3[%c5_65, %c0_66, %c0_67], %69 {strides = array<i32>} : memref<8x2x32xf32, #tpu.memory_space<vmem>>, vector<1x2x32xf32>,
    %c6 = arith.constant 6 : index
    %c0_68 = arith.constant 0 : index
    %c0_69 = arith.constant 0 : index
    %70 = vector.load %arg1[%c6, %c0_68, %c0_69] : memref<8x2x32xf32, #tpu.memory_space<vmem>>, vector<1x2x32xf32>
    %71 = vector.shape_cast %70 : vector<1x2x32xf32> to vector<2x32xf32>
    %c0_70 = arith.constant 0 : index
    %c0_71 = arith.constant 0 : index
    %72 = vector.load %arg4[%c0_70, %c0_71] : memref<2x32xf32, #tpu.memory_space<vmem>>, vector<2x32xf32>
    %cst_72 = arith.constant dense<0.000000e+00> : vector<2x32xf32>
    %73 = tpu.matmul %72, %3, %cst_72 {dimension_numbers = #tpu.dot_dimension_numbers<[1], [0], [0], [1], [0, 0, 1, 1], [], []>} : vector<2x32xf32>, vector<32x32xf32>, vector<2x32xf32> -> vector<2x32xf32>
    %74 = arith.addf %71, %73 : vector<2x32xf32>
    %cst_73 = arith.constant 0.000000e+00 : f32
    %75 = vector.broadcast %cst_73 : f32 to vector<2x32xf32>
    %76 = arith.maximumf %74, %75 : vector<2x32xf32>
    %c0_74 = arith.constant 0 : index
    %c0_75 = arith.constant 0 : index
    %77 = vector.load %arg4[%c0_74, %c0_75] : memref<2x32xf32, #tpu.memory_space<vmem>>, vector<2x32xf32>
    tpu.vector_store %arg4[%c0_74, %c0_75], %76 {strides = array<i32>} : memref<2x32xf32, #tpu.memory_space<vmem>>, vector<2x32xf32>,
    %c6_76 = arith.constant 6 : index
    %c0_77 = arith.constant 0 : index
    %c0_78 = arith.constant 0 : index
    %78 = vector.load %arg3[%c6_76, %c0_77, %c0_78] : memref<8x2x32xf32, #tpu.memory_space<vmem>>, vector<1x2x32xf32>
    %79 = vector.shape_cast %78 : vector<1x2x32xf32> to vector<2x32xf32>
    %80 = vector.shape_cast %76 : vector<2x32xf32> to vector<1x2x32xf32>
    tpu.vector_store %arg3[%c6_76, %c0_77, %c0_78], %80 {strides = array<i32>} : memref<8x2x32xf32, #tpu.memory_space<vmem>>, vector<1x2x32xf32>,
    %c7 = arith.constant 7 : index
    %c0_79 = arith.constant 0 : index
    %c0_80 = arith.constant 0 : index
    %81 = vector.load %arg1[%c7, %c0_79, %c0_80] : memref<8x2x32xf32, #tpu.memory_space<vmem>>, vector<1x2x32xf32>
    %82 = vector.shape_cast %81 : vector<1x2x32xf32> to vector<2x32xf32>
    %c0_81 = arith.constant 0 : index
    %c0_82 = arith.constant 0 : index
    %83 = vector.load %arg4[%c0_81, %c0_82] : memref<2x32xf32, #tpu.memory_space<vmem>>, vector<2x32xf32>
    %cst_83 = arith.constant dense<0.000000e+00> : vector<2x32xf32>
    %84 = tpu.matmul %83, %3, %cst_83 {dimension_numbers = #tpu.dot_dimension_numbers<[1], [0], [0], [1], [0, 0, 1, 1], [], []>} : vector<2x32xf32>, vector<32x32xf32>, vector<2x32xf32> -> vector<2x32xf32>
    %85 = arith.addf %82, %84 : vector<2x32xf32>
    %cst_84 = arith.constant 0.000000e+00 : f32
    %86 = vector.broadcast %cst_84 : f32 to vector<2x32xf32>
    %87 = arith.maximumf %85, %86 : vector<2x32xf32>
    %c0_85 = arith.constant 0 : index
    %c0_86 = arith.constant 0 : index
    %88 = vector.load %arg4[%c0_85, %c0_86] : memref<2x32xf32, #tpu.memory_space<vmem>>, vector<2x32xf32>
    tpu.vector_store %arg4[%c0_85, %c0_86], %87 {strides = array<i32>} : memref<2x32xf32, #tpu.memory_space<vmem>>, vector<2x32xf32>,
    %c7_87 = arith.constant 7 : index
    %c0_88 = arith.constant 0 : index
    %c0_89 = arith.constant 0 : index
    %89 = vector.load %arg3[%c7_87, %c0_88, %c0_89] : memref<8x2x32xf32, #tpu.memory_space<vmem>>, vector<1x2x32xf32>
    %90 = vector.shape_cast %89 : vector<1x2x32xf32> to vector<2x32xf32>
    %91 = vector.shape_cast %87 : vector<2x32xf32> to vector<1x2x32xf32>
    tpu.vector_store %arg3[%c7_87, %c0_88, %c0_89], %91 {strides = array<i32>} : memref<8x2x32xf32, #tpu.memory_space<vmem>>, vector<1x2x32xf32>,
    return
  }
  func.func @transform_0(%arg0: i32) -> (i32, i32, i32) {
    %c0_i32 = arith.constant 0 : i32
    %c0_i32_0 = arith.constant 0 : i32
    %c0_i32_1 = arith.constant 0 : i32
    return %arg0, %c0_i32, %c0_i32_0 : i32, i32, i32
  }
  func.func @transform_1(%arg0: i32) -> (i32, i32) {
    %c0_i32 = arith.constant 0 : i32
    %c0_i32_0 = arith.constant 0 : i32
    %c0_i32_1 = arith.constant 0 : i32
    return %c0_i32, %c0_i32_0 : i32, i32
  }
  func.func @transform_2(%arg0: i32) -> (i32, i32, i32) {
    %c0_i32 = arith.constant 0 : i32
    %c0_i32_0 = arith.constant 0 : i32
    %c0_i32_1 = arith.constant 0 : i32
    return %arg0, %c0_i32, %c0_i32_0 : i32, i32, i32
  }
}

module attributes {stable_mosaic.version = 11 : i64} {
  func.func @_proj_kernel(%arg0: i32, %arg1: memref<16x16xf32, #tpu.memory_space<vmem>>, %arg2: memref<16x32xf32, #tpu.memory_space<vmem>>, %arg3: memref<1x32xf32, #tpu.memory_space<vmem>>, %arg4: memref<16x32xf32, #tpu.memory_space<vmem>>) attributes {dimension_semantics = [#tpu.dimension_semantics<parallel>], iteration_bounds = array<i64: 1>, scalar_prefetch = 0 : i64, scratch_operands = 0 : i64, tpu.core_type = #tpu.core_type<tc>, window_params = [{transform_indices = @transform_0, window_bounds = array<i64: 16, 16>}, {pipeline_mode = #tpu.pipeline_mode<synchronous>, transform_indices = @transform_1, window_bounds = array<i64: 16, 32>}, {pipeline_mode = #tpu.pipeline_mode<synchronous>, transform_indices = @transform_2, window_bounds = array<i64: 1, 32>}, {transform_indices = @transform_3, window_bounds = array<i64: 16, 32>}]} {
    %c0 = arith.constant 0 : index
    %c0_0 = arith.constant 0 : index
    %0 = vector.load %arg1[%c0, %c0_0] : memref<16x16xf32, #tpu.memory_space<vmem>>, vector<16x16xf32>
    %c0_1 = arith.constant 0 : index
    %c0_2 = arith.constant 0 : index
    %1 = vector.load %arg2[%c0_1, %c0_2] : memref<16x32xf32, #tpu.memory_space<vmem>>, vector<16x32xf32>
    %cst = arith.constant dense<0.000000e+00> : vector<16x32xf32>
    %2 = tpu.matmul %0, %1, %cst {dimension_numbers = #tpu.dot_dimension_numbers<[1], [0], [0], [1], [0, 0, 1, 1], [], []>} : vector<16x16xf32>, vector<16x32xf32>, vector<16x32xf32> -> vector<16x32xf32>
    %c0_3 = arith.constant 0 : index
    %c0_4 = arith.constant 0 : index
    %3 = vector.load %arg3[%c0_3, %c0_4] : memref<1x32xf32, #tpu.memory_space<vmem>>, vector<1x32xf32>
    %4 = vector.broadcast %3 : vector<1x32xf32> to vector<16x32xf32>
    %5 = arith.addf %2, %4 : vector<16x32xf32>
    %c0_5 = arith.constant 0 : index
    %c0_6 = arith.constant 0 : index
    %6 = vector.load %arg4[%c0_5, %c0_6] : memref<16x32xf32, #tpu.memory_space<vmem>>, vector<16x32xf32>
    tpu.vector_store %arg4[%c0_5, %c0_6], %5 {strides = array<i32>} : memref<16x32xf32, #tpu.memory_space<vmem>>, vector<16x32xf32>,
    return
  }
  func.func @transform_0(%arg0: i32) -> (i32, i32) {
    %c0_i32 = arith.constant 0 : i32
    %c0_i32_0 = arith.constant 0 : i32
    return %arg0, %c0_i32 : i32, i32
  }
  func.func @transform_1(%arg0: i32) -> (i32, i32) {
    %c0_i32 = arith.constant 0 : i32
    %c0_i32_0 = arith.constant 0 : i32
    %c0_i32_1 = arith.constant 0 : i32
    return %c0_i32, %c0_i32_0 : i32, i32
  }
  func.func @transform_2(%arg0: i32) -> (i32, i32) {
    %c0_i32 = arith.constant 0 : i32
    %c0_i32_0 = arith.constant 0 : i32
    %c0_i32_1 = arith.constant 0 : i32
    return %c0_i32, %c0_i32_0 : i32, i32
  }
  func.func @transform_3(%arg0: i32) -> (i32, i32) {
    %c0_i32 = arith.constant 0 : i32
    %c0_i32_0 = arith.constant 0 : i32
    return %arg0, %c0_i32 : i32, i32
  }
}

module attributes {stable_mosaic.version = 11 : i64} {
  func.func @_proj_kernel(%arg0: i32, %arg1: memref<16x32xf32, #tpu.memory_space<vmem>>, %arg2: memref<32x32xf32, #tpu.memory_space<vmem>>, %arg3: memref<1x32xf32, #tpu.memory_space<vmem>>, %arg4: memref<16x32xf32, #tpu.memory_space<vmem>>) attributes {dimension_semantics = [#tpu.dimension_semantics<parallel>], iteration_bounds = array<i64: 1>, scalar_prefetch = 0 : i64, scratch_operands = 0 : i64, tpu.core_type = #tpu.core_type<tc>, window_params = [{transform_indices = @transform_0, window_bounds = array<i64: 16, 32>}, {pipeline_mode = #tpu.pipeline_mode<synchronous>, transform_indices = @transform_1, window_bounds = array<i64: 32, 32>}, {pipeline_mode = #tpu.pipeline_mode<synchronous>, transform_indices = @transform_2, window_bounds = array<i64: 1, 32>}, {transform_indices = @transform_3, window_bounds = array<i64: 16, 32>}]} {
    %c0 = arith.constant 0 : index
    %c0_0 = arith.constant 0 : index
    %0 = vector.load %arg1[%c0, %c0_0] : memref<16x32xf32, #tpu.memory_space<vmem>>, vector<16x32xf32>
    %c0_1 = arith.constant 0 : index
    %c0_2 = arith.constant 0 : index
    %1 = vector.load %arg2[%c0_1, %c0_2] : memref<32x32xf32, #tpu.memory_space<vmem>>, vector<32x32xf32>
    %cst = arith.constant dense<0.000000e+00> : vector<16x32xf32>
    %2 = tpu.matmul %0, %1, %cst {dimension_numbers = #tpu.dot_dimension_numbers<[1], [0], [0], [1], [0, 0, 1, 1], [], []>} : vector<16x32xf32>, vector<32x32xf32>, vector<16x32xf32> -> vector<16x32xf32>
    %c0_3 = arith.constant 0 : index
    %c0_4 = arith.constant 0 : index
    %3 = vector.load %arg3[%c0_3, %c0_4] : memref<1x32xf32, #tpu.memory_space<vmem>>, vector<1x32xf32>
    %4 = vector.broadcast %3 : vector<1x32xf32> to vector<16x32xf32>
    %5 = arith.addf %2, %4 : vector<16x32xf32>
    %c0_5 = arith.constant 0 : index
    %c0_6 = arith.constant 0 : index
    %6 = vector.load %arg4[%c0_5, %c0_6] : memref<16x32xf32, #tpu.memory_space<vmem>>, vector<16x32xf32>
    tpu.vector_store %arg4[%c0_5, %c0_6], %5 {strides = array<i32>} : memref<16x32xf32, #tpu.memory_space<vmem>>, vector<16x32xf32>,
    return
  }
  func.func @transform_0(%arg0: i32) -> (i32, i32) {
    %c0_i32 = arith.constant 0 : i32
    %c0_i32_0 = arith.constant 0 : i32
    return %arg0, %c0_i32 : i32, i32
  }
  func.func @transform_1(%arg0: i32) -> (i32, i32) {
    %c0_i32 = arith.constant 0 : i32
    %c0_i32_0 = arith.constant 0 : i32
    %c0_i32_1 = arith.constant 0 : i32
    return %c0_i32, %c0_i32_0 : i32, i32
  }
  func.func @transform_2(%arg0: i32) -> (i32, i32) {
    %c0_i32 = arith.constant 0 : i32
    %c0_i32_0 = arith.constant 0 : i32
    %c0_i32_1 = arith.constant 0 : i32
    return %c0_i32, %c0_i32_0 : i32, i32
  }
  func.func @transform_3(%arg0: i32) -> (i32, i32) {
    %c0_i32 = arith.constant 0 : i32
    %c0_i32_0 = arith.constant 0 : i32
    return %arg0, %c0_i32 : i32, i32
  }
}

module attributes {stable_mosaic.version = 11 : i64} {
  func.func @_fc_logsoftmax_kernel(%arg0: memref<2x32xf32, #tpu.memory_space<vmem>>, %arg1: memref<32x10xf32, #tpu.memory_space<vmem>>, %arg2: memref<1x10xf32, #tpu.memory_space<vmem>>, %arg3: memref<2x10xf32, #tpu.memory_space<vmem>>) attributes {dimension_semantics = [], scalar_prefetch = 0 : i64, scratch_operands = 0 : i64, tpu.core_type = #tpu.core_type<tc>} {
    %c0 = arith.constant 0 : index
    %c0_0 = arith.constant 0 : index
    %0 = vector.load %arg0[%c0, %c0_0] : memref<2x32xf32, #tpu.memory_space<vmem>>, vector<2x32xf32>
    %c0_1 = arith.constant 0 : index
    %c0_2 = arith.constant 0 : index
    %1 = vector.load %arg1[%c0_1, %c0_2] : memref<32x10xf32, #tpu.memory_space<vmem>>, vector<32x10xf32>
    %cst = arith.constant dense<0.000000e+00> : vector<2x10xf32>
    %2 = tpu.matmul %0, %1, %cst {dimension_numbers = #tpu.dot_dimension_numbers<[1], [0], [0], [1], [0, 0, 1, 1], [], []>} : vector<2x32xf32>, vector<32x10xf32>, vector<2x10xf32> -> vector<2x10xf32>
    %c0_3 = arith.constant 0 : index
    %c0_4 = arith.constant 0 : index
    %3 = vector.load %arg2[%c0_3, %c0_4] : memref<1x10xf32, #tpu.memory_space<vmem>>, vector<1x10xf32>
    %4 = vector.broadcast %3 : vector<1x10xf32> to vector<2x10xf32>
    %5 = arith.addf %2, %4 : vector<2x10xf32>
    %cst_5 = arith.constant dense<0xFF800000> : vector<2xf32>
    %6 = vector.multi_reduction <maximumf>, %5, %cst_5 [1] : vector<2x10xf32> to vector<2xf32>
    %7 = vector.shape_cast %6 : vector<2xf32> to vector<2x1xf32>
    %8 = vector.broadcast %7 : vector<2x1xf32> to vector<2x10xf32>
    %9 = arith.subf %5, %8 : vector<2x10xf32>
    %10 = math.exp %9 : vector<2x10xf32>
    %cst_6 = arith.constant dense<0.000000e+00> : vector<2xf32>
    %11 = vector.multi_reduction <add>, %10, %cst_6 [1] : vector<2x10xf32> to vector<2xf32>
    %12 = vector.shape_cast %11 : vector<2xf32> to vector<2x1xf32>
    %13 = math.log %12 : vector<2x1xf32>
    %14 = vector.broadcast %13 : vector<2x1xf32> to vector<2x10xf32>
    %15 = arith.subf %9, %14 : vector<2x10xf32>
    %c0_7 = arith.constant 0 : index
    %c0_8 = arith.constant 0 : index
    %16 = vector.load %arg3[%c0_7, %c0_8] : memref<2x10xf32, #tpu.memory_space<vmem>>, vector<2x10xf32>
    tpu.vector_store %arg3[%c0_7, %c0_8], %15 {strides = array<i32>} : memref<2x10xf32, #tpu.memory_space<vmem>>, vector<2x10xf32>,
    return
  }
}

</mosaic_0001>

<bundles_post_ra>
// kernel: rnn_model_forward.7
= control target key start
LH: loop header
LB: loop body
LE: loop exit
PB: predicated region body
PF: predicated region fallthrough
CT: control target
= control target key end

     0   :  { %vm27_vm0 = vcmask 261120   ;;  %s186_s1 = inlined_call_operand.vmem [shape: f32[32,32], index: 1, kind: input, shape index: {}]   ;;  %s187_s0 = inlined_call_operand.vmem [shape: f32[16,32], index: 0, kind: input, shape index: {}]   ;;  %s188_s2 = inlined_call_operand.vmem [shape: f32[1,32], index: 2, kind: input, shape index: {}]   ;;  %s189_s3 = inlined_call_operand.vmem [shape: f32[16,32], index: 3, kind: output, shape index: {}]  }
   0x1   :  { %v19_v0 = vld [vmem:[%s186_s1 + $0x18] sm:$0xff]  ;;  %v18_v1 = vld [vmem:[%s186_s1 + $0x10] sm:$0xff]  ;;  %v14_v2 = vld [vmem:[%s187_s0] sm:$0xff] }
   0x2   :  { %124 = vmatprep.subr.mxu0 %v19_v0  ;;  %v17_v3 = vld [vmem:[%s186_s1 + $0x8] sm:$0xff]  ;;  %132 = vmatprep.mubr.msk.f32.mxu0 %vm27_vm0, %v14_v2  ;;  %v16_v4 = vld [vmem:[%s186_s1] sm:$0xff] }
   0x3   :  { %125 = vmatpush3.msra.mxu0 %v19_v0  ;;  %v15_v5 = vld [vmem:[%s187_s0 + $0x8] sm:$0xff]  ;;  %v115_v6 = vld [vmem:[%s188_s2] ss:$0 sm:$0xff] }
   0x4   :  { %126 = vmatprep.subr.mxu0 %v18_v1 }
   0x5   :  { %127 = vmatpush3.msra.mxu0 %v18_v1 }
   0x6   :  { %128 = vmatprep.subr.mxu0 %v17_v3 }
   0x7   :  { %129 = vmatpush3.msra.mxu0 %v17_v3 }
   0x8   :  { %130 = vmatprep.subr.mxu0 %v16_v4 }
   0x9   :  { %131 = vmatpush3.msra.mxu0 %v16_v4 }
   0xa   :  { %133 = vmatmul.mubr.msk.f32.vlgmr.msra.gmra.mxu0 %vm27_vm0, %v15_v5 }
  0xca   :  { %v134_v7 = vpop.f32.mrf.mxu0 }
  0xcb   :  { %v106_v8 = vadd.f32 %v134_v7, %v115_v6 }
  0xcc   :  { %v100_v9 = vpop.f32.mrf.mxu0 }
  0xcd   :  { %110 = vst.msk [vmem:[%s189_s3 + $0x8] sm:$0xff] %vm27_vm0, %v106_v8  ;;  %v101_v10 = vadd.f32 %v115_v6, %v100_v9 }
  0xcf   :  { %109 = vst.msk [vmem:[%s189_s3] sm:$0xff] %vm27_vm0, %v101_v10 }

// kernel: rnn_model_forward.5
= control target key start
LH: loop header
LB: loop body
LE: loop exit
PB: predicated region body
PF: predicated region fallthrough
CT: control target
= control target key end

     0   :  { %vm25_vm0 = vcmask 130048   ;;  %vm107_vm1 = vcmask 261120   ;;  %s169_s1 = inlined_call_operand.vmem [shape: f32[16,32], index: 1, kind: input, shape index: {}]   ;;  %s170_s0 = inlined_call_operand.vmem [shape: f32[16,16], index: 0, kind: input, shape index: {}]   ;;  %s171_s2 = inlined_call_operand.vmem [shape: f32[1,32], index: 2, kind: input, shape index: {}]   ;;  %s172_s3 = inlined_call_operand.vmem [shape: f32[16,32], index: 3, kind: output, shape index: {}]  }
   0x1   :  { %v17_v0 = vld [vmem:[%s169_s1 + $0x8] sm:$0xff]  ;;  %v16_v1 = vld [vmem:[%s169_s1] sm:$0xff] }
   0x2   :  { %v14_v2 = vld [vmem:[%s170_s0] sm:$0xff]  ;;  %121 = vmatprep.subr.mxu0 %v17_v0  ;;  %v15_v3 = vld [vmem:[%s170_s0 + $0x8] sm:$0xff] }
   0x3   :  { %125 = vmatprep.mubr.msk.f32.mxu0 %vm25_vm0, %v14_v2  ;;  %122 = vmatpush3.msra.mxu0 %v17_v0  ;;  %v114_v4 = vld [vmem:[%s171_s2] ss:$0 sm:$0xff] }
   0x4   :  { %123 = vmatprep.subr.mxu0 %v16_v1 }
   0x5   :  { %124 = vmatpush3.msra.mxu0 %v16_v1 }
   0x6   :  { %126 = vmatmul.mubr.msk.f32.vlgmr.msra.gmra.mxu0 %vm25_vm0, %v15_v3 }
  0xc6   :  { %v127_v5 = vpop.f32.mrf.mxu0 }
  0xc7   :  { %v104_v6 = vadd.f32 %v127_v5, %v114_v4 }
  0xc8   :  { %v98_v7 = vpop.f32.mrf.mxu0 }
  0xc9   :  { %109 = vst.msk [vmem:[%s172_s3 + $0x8] sm:$0xff] %vm107_vm1, %v104_v6  ;;  %v99_v8 = vadd.f32 %v114_v4, %v98_v7 }
  0xcb   :  { %108 = vst.msk [vmem:[%s172_s3] sm:$0xff] %vm107_vm1, %v99_v8 }

// kernel: rnn_model_forward.6
= control target key start
LH: loop header
LB: loop body
LE: loop exit
PB: predicated region body
PF: predicated region fallthrough
CT: control target
= control target key end

     0   :  { %vm15_vm0 = vcmask 254976   ;;  %v825_v0 = vmov 0.0   ;;  %vm826_vm1 = vmmov 0   ;;  %vm23_vm2 = vcmask 261120   ;;  %s1016_s1 = inlined_call_operand.vmem [shape: f32[32,32], index: 1, kind: input, shape index: {}]   ;;  %s1017_s0 = inlined_call_operand.vmem [shape: f32[8,2,32], index: 0, kind: input, shape index: {}]   ;;  %s1018_s2 = inlined_call_operand.vmem [shape: f32[8,2,32], index: 2, kind: output, shape index: {}]  }
   0x1   :  { %735 = vmatprep.subr.mxu0 %v825_v0  ;;  %v846_v1 = vld [vmem:[%s1016_s1 + $0x18] sm:$0xff]  ;;  %v851_v2 = vld [vmem:[%s1016_s1 + $0x10] sm:$0xff]  ;;  %743 = vmatprep.mubr.msk.f32.mxu0 %vm826_vm1, %v825_v0  ;;  %16 = vst.msk [vmem:[#allocation2] sm:$0x3] %vm15_vm0, %v825_v0  ;;  %v863_v3 = vld [vmem:[%s1016_s1 + $0x8] sm:$0xff] }
   0x2   :  { %736 = vmatpush3.msra.mxu0 %v846_v1  ;;  %746 = vmatprep.subr.mxu1 %v825_v0  ;;  %v872_v4 = vld [vmem:[%s1016_s1] sm:$0xff]  ;;  %v683_v30 = vld [vmem:[%s1017_s0 + $0x8] sm:$0x3]  ;;  %v686_v36 = vld [vmem:[%s1017_s0 + $0xa] sm:$0x3] }
   0x3   :  { %737 = vmatprep.subr.mxu0 %v825_v0  ;;  %747 = vmatpush3.msra.mxu1 %v846_v1  ;;  %v21_v6 = vld [vmem:[%s1017_s0] sm:$0x3]  ;;  %v674_v12 = vld [vmem:[%s1017_s0 + $0x2] sm:$0x3]  ;;  %v677_v18 = vld [vmem:[%s1017_s0 + $0x4] sm:$0x3] }
   0x4   :  { %738 = vmatpush3.msra.mxu0 %v851_v2  ;;  %748 = vmatprep.subr.mxu1 %v825_v0  ;;  %v680_v24 = vld [vmem:[%s1017_s0 + $0x6] sm:$0x3]  ;;  %v689_v42 = vld [vmem:[%s1017_s0 + $0xc] sm:$0x3]  ;;  %v692_v48 = vld [vmem:[%s1017_s0 + $0xe] sm:$0x3] }
   0x5   :  { %739 = vmatprep.subr.mxu0 %v825_v0  ;;  %749 = vmatpush3.msra.mxu1 %v851_v2 }
   0x6   :  { %740 = vmatpush3.msra.mxu0 %v863_v3  ;;  %750 = vmatprep.subr.mxu1 %v825_v0 }
   0x7   :  { %741 = vmatprep.subr.mxu0 %v825_v0  ;;  %751 = vmatpush3.msra.mxu1 %v863_v3 }
   0x8   :  { %742 = vmatpush3.msra.mxu0 %v872_v4  ;;  %v22_v5 = vld [vmem:[#allocation2] sm:$0x3]  ;;  %752 = vmatprep.subr.mxu1 %v825_v0 }
   0x9   :  { %744 = vmatmul.mubr.msk.f32.vlgmr.msra.gmra.mxu0 %vm23_vm2, %v22_v5  ;;  %753 = vmatpush3.msra.mxu1 %v872_v4 }
   0xa   :  { %754 = vmatprep.mubr.msk.f32.mxu1 %vm826_vm1, %v825_v0  ;;  %757 = vmatprep.subr.mxu0 %v825_v0 }
   0xb   :  { %758 = vmatpush3.msra.mxu0 %v846_v1  ;;  %765 = vmatprep.mubr.msk.f32.mxu0 %vm826_vm1, %v825_v0 }
   0xc   :  { %759 = vmatprep.subr.mxu0 %v825_v0  ;;  %768 = vmatprep.subr.mxu1 %v825_v0 }
   0xd   :  { %760 = vmatpush3.msra.mxu0 %v851_v2 }
   0xe   :  { %761 = vmatprep.subr.mxu0 %v825_v0 }
   0xf   :  { %762 = vmatpush3.msra.mxu0 %v863_v3 }
  0x10   :  { %763 = vmatprep.subr.mxu0 %v825_v0 }
  0x11   :  { %764 = vmatpush3.msra.mxu0 %v872_v4 }
  0x12   :  { %779 = vmatprep.subr.mxu0 %v825_v0 }
  0xc9   :  { %v93_v7 = vpop.f32.mrf.mxu0 }
  0xca   :  { %v97_v8 = vadd.f32 %v93_v7, %v21_v6 }
  0xcb   :  { %v745_v9 = vpop.f32.mrf.mxu0 }
  0xcc   :  { %v98_v10 = vmax.f32 %v97_v8, 0.0 }
  0xce   :  { %100 = vst.msk [vmem:[#allocation2] sm:$0x3] %vm15_vm0, %v98_v10  ;;  %101 = vst.msk [vmem:[%s1018_s2] sm:$0x3] %vm15_vm0, %v98_v10 }
  0xd5   :  { %v104_v11 = vld [vmem:[#allocation2] sm:$0x3] }
  0xd6   :  { %755 = vmatmul.mubr.msk.f32.vlgmr.msra.gmra.mxu1 %vm23_vm2, %v104_v11 }
  0xd7   :  { %769 = vmatpush3.msra.mxu1 %v846_v1  ;;  %776 = vmatprep.mubr.msk.f32.mxu1 %vm826_vm1, %v825_v0 }
  0xd8   :  { %770 = vmatprep.subr.mxu1 %v825_v0 }
  0xd9   :  { %771 = vmatpush3.msra.mxu1 %v851_v2 }
  0xda   :  { %772 = vmatprep.subr.mxu1 %v825_v0 }
  0xdb   :  { %773 = vmatpush3.msra.mxu1 %v863_v3 }
  0xdc   :  { %774 = vmatprep.subr.mxu1 %v825_v0 }
  0xdd   :  { %775 = vmatpush3.msra.mxu1 %v872_v4 }
  0xde   :  { %790 = vmatprep.subr.mxu1 %v825_v0 }
 0x196   :  { %v174_v13 = vpop.f32.mrf.mxu1 }
 0x197   :  { %v178_v14 = vadd.f32 %v674_v12, %v174_v13 }
 0x198   :  { %v756_v15 = vpop.f32.mrf.mxu1 }
 0x199   :  { %v179_v16 = vmax.f32 %v178_v14, 0.0 }
 0x19b   :  { %180 = vst.msk [vmem:[#allocation2] sm:$0x3] %vm15_vm0, %v179_v16  ;;  %676 = vst.msk [vmem:[%s1018_s2 + $0x2] sm:$0x3] %vm15_vm0, %v179_v16 }
 0x1a2   :  { %v185_v17 = vld [vmem:[#allocation2] sm:$0x3] }
 0x1a3   :  { %766 = vmatmul.mubr.msk.f32.vlgmr.msra.gmra.mxu0 %vm23_vm2, %v185_v17 }
 0x1a4   :  { %780 = vmatpush3.msra.mxu0 %v846_v1  ;;  %787 = vmatprep.mubr.msk.f32.mxu0 %vm826_vm1, %v825_v0 }
 0x1a5   :  { %781 = vmatprep.subr.mxu0 %v825_v0 }
 0x1a6   :  { %782 = vmatpush3.msra.mxu0 %v851_v2 }
 0x1a7   :  { %783 = vmatprep.subr.mxu0 %v825_v0 }
 0x1a8   :  { %784 = vmatpush3.msra.mxu0 %v863_v3 }
 0x1a9   :  { %785 = vmatprep.subr.mxu0 %v825_v0 }
 0x1aa   :  { %786 = vmatpush3.msra.mxu0 %v872_v4 }
 0x1ab   :  { %801 = vmatprep.subr.mxu0 %v825_v0 }
 0x263   :  { %v255_v19 = vpop.f32.mrf.mxu0 }
 0x264   :  { %v259_v20 = vadd.f32 %v677_v18, %v255_v19 }
 0x265   :  { %v767_v21 = vpop.f32.mrf.mxu0 }
 0x266   :  { %v260_v22 = vmax.f32 %v259_v20, 0.0 }
 0x268   :  { %261 = vst.msk [vmem:[#allocation2] sm:$0x3] %vm15_vm0, %v260_v22  ;;  %679 = vst.msk [vmem:[%s1018_s2 + $0x4] sm:$0x3] %vm15_vm0, %v260_v22 }
 0x26f   :  { %v266_v23 = vld [vmem:[#allocation2] sm:$0x3] }
 0x270   :  { %777 = vmatmul.mubr.msk.f32.vlgmr.msra.gmra.mxu1 %vm23_vm2, %v266_v23 }
 0x271   :  { %791 = vmatpush3.msra.mxu1 %v846_v1  ;;  %798 = vmatprep.mubr.msk.f32.mxu1 %vm826_vm1, %v825_v0 }
 0x272   :  { %792 = vmatprep.subr.mxu1 %v825_v0 }
 0x273   :  { %793 = vmatpush3.msra.mxu1 %v851_v2 }
 0x274   :  { %794 = vmatprep.subr.mxu1 %v825_v0 }
 0x275   :  { %795 = vmatpush3.msra.mxu1 %v863_v3 }
 0x276   :  { %796 = vmatprep.subr.mxu1 %v825_v0 }
 0x277   :  { %797 = vmatpush3.msra.mxu1 %v872_v4 }
 0x278   :  { %812 = vmatprep.subr.mxu1 %v825_v0 }
 0x330   :  { %v336_v25 = vpop.f32.mrf.mxu1 }
 0x331   :  { %v340_v26 = vadd.f32 %v680_v24, %v336_v25 }
 0x332   :  { %v778_v27 = vpop.f32.mrf.mxu1 }
 0x333   :  { %v341_v28 = vmax.f32 %v340_v26, 0.0 }
 0x335   :  { %342 = vst.msk [vmem:[#allocation2] sm:$0x3] %vm15_vm0, %v341_v28  ;;  %682 = vst.msk [vmem:[%s1018_s2 + $0x6] sm:$0x3] %vm15_vm0, %v341_v28 }
 0x33c   :  { %v347_v29 = vld [vmem:[#allocation2] sm:$0x3] }
 0x33d   :  { %788 = vmatmul.mubr.msk.f32.vlgmr.msra.gmra.mxu0 %vm23_vm2, %v347_v29 }
 0x33e   :  { %802 = vmatpush3.msra.mxu0 %v846_v1  ;;  %809 = vmatprep.mubr.msk.f32.mxu0 %vm826_vm1, %v825_v0 }
 0x33f   :  { %803 = vmatprep.subr.mxu0 %v825_v0 }
 0x340   :  { %804 = vmatpush3.msra.mxu0 %v851_v2 }
 0x341   :  { %805 = vmatprep.subr.mxu0 %v825_v0 }
 0x342   :  { %806 = vmatpush3.msra.mxu0 %v863_v3 }
 0x343   :  { %807 = vmatprep.subr.mxu0 %v825_v0 }
 0x344   :  { %808 = vmatpush3.msra.mxu0 %v872_v4 }
 0x3fd   :  { %v417_v31 = vpop.f32.mrf.mxu0 }
 0x3fe   :  { %v421_v32 = vadd.f32 %v683_v30, %v417_v31 }
 0x3ff   :  { %v789_v33 = vpop.f32.mrf.mxu0 }
 0x400   :  { %v422_v34 = vmax.f32 %v421_v32, 0.0 }
 0x402   :  { %423 = vst.msk [vmem:[#allocation2] sm:$0x3] %vm15_vm0, %v422_v34  ;;  %685 = vst.msk [vmem:[%s1018_s2 + $0x8] sm:$0x3] %vm15_vm0, %v422_v34 }
 0x409   :  { %v428_v35 = vld [vmem:[#allocation2] sm:$0x3] }
 0x40a   :  { %799 = vmatmul.mubr.msk.f32.vlgmr.msra.gmra.mxu1 %vm23_vm2, %v428_v35 }
 0x40b   :  { %813 = vmatpush3.msra.mxu1 %v846_v1  ;;  %820 = vmatprep.mubr.msk.f32.mxu1 %vm826_vm1, %v825_v0 }
 0x40c   :  { %814 = vmatprep.subr.mxu1 %v825_v0 }
 0x40d   :  { %815 = vmatpush3.msra.mxu1 %v851_v2 }
 0x40e   :  { %816 = vmatprep.subr.mxu1 %v825_v0 }
 0x40f   :  { %817 = vmatpush3.msra.mxu1 %v863_v3 }
 0x410   :  { %818 = vmatprep.subr.mxu1 %v825_v0 }
 0x411   :  { %819 = vmatpush3.msra.mxu1 %v872_v4 }
 0x4ca   :  { %v498_v37 = vpop.f32.mrf.mxu1 }
 0x4cb   :  { %v502_v38 = vadd.f32 %v686_v36, %v498_v37 }
 0x4cc   :  { %v800_v39 = vpop.f32.mrf.mxu1 }
 0x4cd   :  { %v503_v40 = vmax.f32 %v502_v38, 0.0 }
 0x4cf   :  { %688 = vst.msk [vmem:[%s1018_s2 + $0xa] sm:$0x3] %vm15_vm0, %v503_v40  ;;  %504 = vst.msk [vmem:[#allocation2] sm:$0x3] %vm15_vm0, %v503_v40 }
 0x4d6   :  { %v509_v41 = vld [vmem:[#allocation2] sm:$0x3] }
 0x4d7   :  { %810 = vmatmul.mubr.msk.f32.vlgmr.msra.gmra.mxu0 %vm23_vm2, %v509_v41 }
 0x597   :  { %v579_v43 = vpop.f32.mrf.mxu0 }
 0x598   :  { %v583_v44 = vadd.f32 %v689_v42, %v579_v43 }
 0x599   :  { %v811_v45 = vpop.f32.mrf.mxu0 }
 0x59a   :  { %v584_v46 = vmax.f32 %v583_v44, 0.0 }
 0x59c   :  { %691 = vst.msk [vmem:[%s1018_s2 + $0xc] sm:$0x3] %vm15_vm0, %v584_v46  ;;  %585 = vst.msk [vmem:[#allocation2] sm:$0x3] %vm15_vm0, %v584_v46 }
 0x5a3   :  { %v590_v47 = vld [vmem:[#allocation2] sm:$0x3] }
 0x5a4   :  { %821 = vmatmul.mubr.msk.f32.vlgmr.msra.gmra.mxu1 %vm23_vm2, %v590_v47 }
 0x664   :  { %v660_v49 = vpop.f32.mrf.mxu1 }
 0x665   :  { %v664_v50 = vadd.f32 %v692_v48, %v660_v49 }
 0x666   :  { %v822_v51 = vpop.f32.mrf.mxu1 }
 0x667   :  { %v665_v52 = vmax.f32 %v664_v50, 0.0 }
 0x669   :  { %666 = vst.msk [vmem:[#allocation2] sm:$0x3] %vm15_vm0, %v665_v52  ;;  %694 = vst.msk [vmem:[%s1018_s2 + $0xe] sm:$0x3] %vm15_vm0, %v665_v52 }

// kernel: rnn_model_forward.9
= control target key start
LH: loop header
LB: loop body
LE: loop exit
PB: predicated region body
PF: predicated region fallthrough
CT: control target
= control target key end

     0   :  { %v176_v1 = vmov 0.0   ;;  %vm177_vm0 = vmmov 0   ;;  %s223_s0 = inlined_call_operand.vmem [shape: f32[2,32], index: 0, kind: input, shape index: {}]   ;;  %s224_s1 = inlined_call_operand.vmem [shape: f32[32,10], index: 1, kind: input, shape index: {}]   ;;  %s225_s2 = inlined_call_operand.vmem [shape: f32[1,10], index: 2, kind: input, shape index: {}]   ;;  %s226_s3 = inlined_call_operand.hbm [shape: f32[2,10], index: 3, kind: output, shape index: {}]  }
   0x1   :  { %v19_v0 = vld [vmem:[%s224_s1 + $0x18] sm:$0xff]  ;;  %136 = vmatprep.subr.mxu0 %v176_v1  ;;  %v18_v2 = vld [vmem:[%s224_s1 + $0x10] sm:$0xff]  ;;  %144 = vmatprep.mubr.msk.f32.mxu0 %vm177_vm0, %v176_v1 }
   0x2   :  { %137 = vmatpush3.msra.mxu0 %v19_v0 }
   0x3   :  { %8 = vsyncpa [#allocation3], 0  ;;  %138 = vmatprep.subr.mxu0 %v176_v1  ;;  %v17_v3 = vld [vmem:[%s224_s1 + $0x8] sm:$0xff]  ;;  %v16_v4 = vld [vmem:[%s224_s1] sm:$0xff]  ;;  %vm27_vm1 = vcmask 261120   ;;  %vm101_vm2 = vcmask 74752  }
   0x4   :  { %139 = vmatpush3.msra.mxu0 %v18_v2  ;;  %v15_v5 = vld [vmem:[%s223_s0] sm:$0x3]  ;;  %s178_s0 = smov [#allocation2]  }
   0x5   :  { %140 = vmatprep.subr.mxu0 %v176_v1  ;;  %v129_v6 = vld [vmem:[%s225_s2] ss:$0 sm:$0xff]  ;;  %s121_s1 = sshll.u32 %s178_s0, 4  ;;  %s122_s1 = int_to_ptr.vmem [resolvable:$true] %s121_s1 }
   0x6   :  { %141 = vmatpush3.msra.mxu0 %v17_v3  ;;  %s154_s2 = scalar_lea.vmem %s122_s1, 32  ;;  %p159_p1 = scmp.lt.s32.totalorder %s122_s1, %s122_s1 }
   0x7   :  { %142 = vmatprep.subr.mxu0 %v176_v1  ;;  %p155_p0 = scmp.ne.s32.totalorder %s122_s1, %s154_s2  ;;  %p160_p2 = scmp.lt.s32.totalorder %s154_s2, %s154_s2 }
   0x8   :  { %143 = vmatpush3.msra.mxu0 %v16_v4 }
   0x9   :  { %145 = vmatmul.mubr.msk.f32.vlgmr.msra.gmra.mxu0 %vm27_vm1, %v15_v5  ;;  %p161_p3 = por %p160_p2, %p159_p1 }
   0xb   :  { %p162_p4 = pnand %p161_p3, %p155_p0 }
  0xc9   :  { %v97_v7 = vpop.f32.mrf.mxu0 }
  0xca   :  { %v98_v8 = vadd.f32 %v129_v6, %v97_v7 }
  0xcb   :  { %v146_v9 = vpop.f32.mrf.mxu0 }
  0xcc   :  { %v102_v10 = vsel %vm101_vm2, %v98_v8, -inf }
  0xcd   :  { %103 = vmax.xlane.f32.xlu0 %v102_v10 }
 0x156   :  { %v104_v11 = vpop.xlane.xlu0 %103 }
 0x157   :  { %v105_v12 = vsub.f32 %v98_v8, %v104_v11 }
 0x159   :  { %v106_v13 = vmul.f32 1.442695, %v105_v12 }
 0x15b   :  { %150 = vpow2.f32 %v106_v13 }
 0x168   :  { %v151_v14 = vpop.eup %150 }
 0x169   :  { %v108_v15 = vsel %vm101_vm2, %v151_v14, 0.0 }
 0x16a   :  { %109 = vadd.xlane.f32.xlu0 %v108_v15 }
 0x1f3   :  { %v110_v16 = vpop.xlane.xlu0 %109 }
 0x1f4   :  { %152 = vlog2.f32 %v110_v16 }
 0x201   :  { %v153_v17 = vpop.eup %152 }
 0x202   :  { %v112_v18 = vmul.f32 0.6931472, %v153_v17 }
 0x204   :  { %v113_v19 = vsub.f32 %v105_v12, %v112_v18 }
 0x206   :  { %114 = vst.msk [vmem:[#allocation2] sm:$0x3] %vm101_vm2, %v113_v19 }
 0x207   :  { %165 = shalt.err (!%p162_p4)
}
 0x208   :  { %124 = dma.vmem_to_hbm [thread:$0]  %s122_s1, 32, %s226_s3, [#allocation3]  }
 0x209   :  { %174 = dma.done.wait [#allocation3], 32  }
 0x20a   :  { %175 = vsyncadd [#allocation3], 4294967264 }
 0x20b   :  { %128 = vsyncpa [#allocation3], 1 }

</bundles_post_ra>
